<compile_context>
chip_gen: v7x
topology: tpu7x:2x2x1
jax: 0.10.0
libtpu: 0.0.40
codegen_flags: <defaults>
</compile_context>

<pallas_src>
import jax
import jax.numpy as jnp
from jax.experimental import pallas as pl
from jax.experimental.pallas import tpu as pltpu


def _nmode2_kernel(p_ref, gamma_ref, out_ref):
    # Elementwise hot path: dpdt = -p + sin(p + gamma)^2  (computed in f32).
    p = p_ref[...].astype(jnp.float32)
    g = gamma_ref[...].astype(jnp.float32)
    s = jnp.sin(p + g)
    out_ref[...] = (s * s - p).astype(out_ref.dtype)


def nmode2_forward(t, p, gamma):
    """Computes dpdt = -p + sin(p + gamma)**2 with a Pallas TPU kernel.

    `t` is unused (kept for parity with the PyTorch forward signature).
    `gamma` is typically the same shape as `p` (set via fresh(gamma)).
    """
    del t  # unused, as in the reference module

    if gamma.shape != p.shape:
        # TODO(synk): for genuinely smaller gamma (e.g. per-channel), give it
        # its own BlockSpec instead of materializing the broadcast in HBM.
        gamma = jnp.broadcast_to(gamma, p.shape)
    gamma = gamma.astype(p.dtype)

    orig_shape = p.shape
    n = p.size
    itemsize = jnp.dtype(p.dtype).itemsize
    # Min sublane multiple: 8 for 4-byte, 16 for 2-byte, 32 for 1-byte dtypes.
    sub_mult = max(8, 32 // itemsize)

    # Pick a lane-dense column width that divides n (avoids pad/slice passes).
    cols = None
    for c in (4096, 2048, 1024, 512, 384, 256, 128):
        if n % c == 0:
            cols = c
            break

    needs_pad = cols is None
    if needs_pad:
        # Rare fallback: shapes not divisible by 128 anywhere -> pad once.
        cols = 1024
        rows = pl.cdiv(n, cols)
        padded = rows * cols
        p2 = jnp.pad(p.reshape(-1), (0, padded - n)).reshape(rows, cols)
        g2 = jnp.pad(gamma.reshape(-1), (0, padded - n)).reshape(rows, cols)
    else:
        rows = n // cols
        p2 = p.reshape(rows, cols)
        g2 = gamma.reshape(rows, cols)

    # Block sizing: target ~2 MiB per block so 3 refs x 2 buffers <= ~12 MiB
    # (inside v5e's 16 MiB default scoped VMEM; ample headroom on v6e/v7x).
    target_block_bytes = 2 * 1024 * 1024
    tr = target_block_bytes // (cols * itemsize)
    tr = max(sub_mult, (tr // sub_mult) * sub_mult)
    tile_rows = rows if tr >= rows else tr  # full-dim block is always legal

    grid = (pl.cdiv(rows, tile_rows),)
    spec = pl.BlockSpec((tile_rows, cols), lambda i: (i, 0))

    cost = pl.CostEstimate(
        flops=3 * n,
        transcendentals=n,
        bytes_accessed=3 * n * itemsize,
    )

    out2 = pl.pallas_call(
        _nmode2_kernel,
        out_shape=jax.ShapeDtypeStruct((rows, cols), p.dtype),
        grid_spec=pltpu.PrefetchScalarGridSpec(
            num_scalar_prefetch=0,
            grid=grid,
            in_specs=[spec, spec],
            out_specs=spec,
        ),
        compiler_params=pltpu.CompilerParams(
            dimension_semantics=("parallel",),
        ),
        cost_estimate=cost,
    )(p2, g2)

    if needs_pad:
        return out2.reshape(-1)[:n].reshape(orig_shape)
    return out2.reshape(orig_shape)


def nmode2_reference(t, p, gamma):
    del t
    return -p + jnp.sin(p + gamma) ** 2


if __name__ == "__main__":
    key = jax.random.PRNGKey(0)
    kp, kg = jax.random.split(key)

    # Small NCHW-shaped state, matching a conv-feature-map-sized ODE state.
    shape = (2, 4, 16, 16)
    p = jax.random.normal(kp, shape, dtype=jnp.float32)
    # gamma is set via fresh(gamma) in the PyTorch module; generate it
    # deterministically here with the same shape as p.
    gamma = jax.random.normal(kg, shape, dtype=jnp.float32)
    t = jnp.float32(0.0)  # unused, kept for signature parity
    # TODO(synk): the PyTorch module's self.nfe counter is host-side mutable
    # state with no kernel equivalent; callers should count invocations.

    out = nmode2_forward(t, p, gamma)
    out = jax.block_until_ready(out)

    ref = nmode2_reference(t, p, gamma)
    assert out.shape == shape
    assert out.dtype == jnp.float32
    assert jnp.allclose(out, ref, atol=1e-6, rtol=1e-6)

    print("KERNEL_OK")
</pallas_src>

<mosaic_0001>
module attributes {stable_mosaic.version = 11 : i64} {
  func.func @_nmode2_kernel(%arg0: i32, %arg1: memref<1x2048xf32, #tpu.memory_space<vmem>>, %arg2: memref<1x2048xf32, #tpu.memory_space<vmem>>, %arg3: memref<1x2048xf32, #tpu.memory_space<vmem>>) attributes {dimension_semantics = [#tpu.dimension_semantics<parallel>], iteration_bounds = array<i64: 1>, scalar_prefetch = 0 : i64, scratch_operands = 0 : i64, tpu.core_type = #tpu.core_type<tc>, window_params = [{transform_indices = @transform_0, window_bounds = array<i64: 1, 2048>}, {transform_indices = @transform_1, window_bounds = array<i64: 1, 2048>}, {transform_indices = @transform_2, window_bounds = array<i64: 1, 2048>}]} {
    %c0 = arith.constant 0 : index
    %c0_0 = arith.constant 0 : index
    %0 = vector.load %arg1[%c0, %c0_0] : memref<1x2048xf32, #tpu.memory_space<vmem>>, vector<1x2048xf32>
    %c0_1 = arith.constant 0 : index
    %c0_2 = arith.constant 0 : index
    %1 = vector.load %arg2[%c0_1, %c0_2] : memref<1x2048xf32, #tpu.memory_space<vmem>>, vector<1x2048xf32>
    %2 = arith.addf %0, %1 : vector<1x2048xf32>
    %3 = math.sin %2 : vector<1x2048xf32>
    %4 = arith.mulf %3, %3 : vector<1x2048xf32>
    %5 = arith.subf %4, %0 : vector<1x2048xf32>
    %c0_3 = arith.constant 0 : index
    %c0_4 = arith.constant 0 : index
    %6 = vector.load %arg3[%c0_3, %c0_4] : memref<1x2048xf32, #tpu.memory_space<vmem>>, vector<1x2048xf32>
    tpu.vector_store %arg3[%c0_3, %c0_4], %5 {strides = array<i32>} : memref<1x2048xf32, #tpu.memory_space<vmem>>, vector<1x2048xf32>,
    return
  }
  func.func @transform_0(%arg0: i32) -> (i32, i32) {
    %c0_i32 = arith.constant 0 : i32
    %c0_i32_0 = arith.constant 0 : i32
    return %arg0, %c0_i32 : i32, i32
  }
  func.func @transform_1(%arg0: i32) -> (i32, i32) {
    %c0_i32 = arith.constant 0 : i32
    %c0_i32_0 = arith.constant 0 : i32
    return %arg0, %c0_i32 : i32, i32
  }
  func.func @transform_2(%arg0: i32) -> (i32, i32) {
    %c0_i32 = arith.constant 0 : i32
    %c0_i32_0 = arith.constant 0 : i32
    return %arg0, %c0_i32 : i32, i32
  }
}

</mosaic_0001>

<bundles_post_ra>
// kernel: tpu_custom_call.1
= control target key start
LH: loop header
LB: loop body
LE: loop exit
PB: predicated region body
PF: predicated region fallthrough
CT: control target
= control target key end

     0   :  { %7 = vsyncpa [#allocation3], 0  ;;  %s515_s0 = inlined_call_operand.hbm [shape: f32[1,2048], index: 0, kind: input, shape index: {}]   ;;  %s516_s1 = inlined_call_operand.hbm [shape: f32[1,2048], index: 1, kind: input, shape index: {}]   ;;  %s517_s2 = inlined_call_operand.hbm [shape: f32[1,2048], index: 2, kind: output, shape index: {}]  }
   0x1   :  { %8 = vsyncpa [#allocation6], 0 }
   0x2   :  { %9 = vsyncpa [#allocation4], 0  ;;  %s377_s9 = smov [#allocation2]   ;;  %s378_s11 = smov [#allocation5]  }
   0x3   :  { %s16_s10 = sshll.u32 %s377_s9, 4  ;;  %s26_s12 = sshll.u32 %s378_s11, 4  ;;  %s17_s10 = int_to_ptr.vmem [resolvable:$true] %s16_s10  ;;  %s27_s12 = int_to_ptr.vmem [resolvable:$true] %s26_s12 }
   0x4   :  { %s305_s15 = scalar_lea.hbm %s515_s0, 256 }
   0x5   :  { %p306_p0 = scmp.ne.s32.totalorder %s515_s0, %s305_s15  ;;  %p309_p1 = scmp.lt.u32.totalorder %s305_s15, %s515_s0 }
   0x7   :  { %p311_p2 = pnand %p309_p1, %p306_p0 }
   0x9   :  { %314 = shalt.err (!%p311_p2)
}
   0xa   :  { %s315_s20 = scalar_lea.vmem %s17_s10, 256  ;;  %p320_p4 = scmp.lt.s32.totalorder %s17_s10, %s17_s10 }
   0xb   :  { %p316_p3 = scmp.ne.s32.totalorder %s17_s10, %s315_s20  ;;  %p321_p5 = scmp.lt.s32.totalorder %s315_s20, %s315_s20 }
   0xd   :  { %p322_p6 = por %p321_p5, %p320_p4 }
   0xf   :  { %p323_p7 = pnand %p322_p6, %p316_p3 }
  0x11   :  { %326 = shalt.err (!%p323_p7)
}
  0x12   :  { %19 = dma.hbm_to_vmem [thread:$0]  %s515_s0, 256, %s17_s10, [#allocation3]  }
  0x13   :  { %s327_s25 = scalar_lea.hbm %s516_s1, 256 }
  0x14   :  { %p328_p8 = scmp.ne.s32.totalorder %s516_s1, %s327_s25  ;;  %p331_p9 = scmp.lt.u32.totalorder %s327_s25, %s516_s1 }
  0x16   :  { %p333_p10 = pnand %p331_p9, %p328_p8 }
  0x18   :  { %336 = shalt.err (!%p333_p10)
}
  0x19   :  { %s337_s30 = scalar_lea.vmem %s27_s12, 256  ;;  %p342_p12 = scmp.lt.s32.totalorder %s27_s12, %s27_s12 }
  0x1a   :  { %p338_p11 = scmp.ne.s32.totalorder %s27_s12, %s337_s30  ;;  %p343_p13 = scmp.lt.s32.totalorder %s337_s30, %s337_s30 }
  0x1c   :  { %p344_p0 = por %p343_p13, %p342_p12 }
  0x1e   :  { %p345_p1 = pnand %p344_p0, %p338_p11 }
  0x20   :  { %348 = shalt.err (!%p345_p1)
}
  0x21   :  { %29 = dma.hbm_to_vmem [thread:$0]  %s516_s1, 256, %s27_s12, [#allocation6]  }
  0x22   :  { %371 = dma.done.wait [#allocation3], 256  }
  0x23   :  { %372 = vsyncadd [#allocation3], 4294967040 }
  0x24   :  { %373 = dma.done.wait [#allocation6], 256  }
  0x25   :  { %374 = vsyncadd [#allocation6], 4294967040  ;;  %v425_v0 = vld [vmem:[#allocation2] sm:$0xff]  ;;  %v38_v1 = vld [vmem:[#allocation5] sm:$0xff]  ;;  %v379_v28 = vmov 683565275  }
  0x26   :  { %v427_v2 = vld [vmem:[#allocation2 + $0x8] sm:$0xff]  ;;  %v430_v3 = vadd.f32 %v38_v1, %v425_v0  ;;  %v39_v4 = vld [vmem:[#allocation5 + $0x8] sm:$0xff]  ;;  %v380_v30 = vmov 2475754826   ;;  %v381_v32 = vmov 2131351028  }
  0x27   :  { %v433_v5 = vadd.f32 %v39_v4, %v427_v2  ;;  %v382_v34 = vmov 2102212464   ;;  %v383_v36 = vmov 920167782   ;;  %v384_v44 = vmov 1326507024  }
  0x28   :  { %v42_v6 = vand.u32 2147483647, %v430_v3  ;;  %v45_v7 = vand.u32 2139095040, %v430_v3  ;;  %vm44_vm14 = vcmp.lt.s32.totalorder %v430_v3, 0  ;;  %s385_s1 = smov [#allocation7]  }
  0x29   :  { %v146_v8 = vand.u32 2147483647, %v433_v5  ;;  %v149_v9 = vand.u32 2139095040, %v433_v5  ;;  %s262_s4 = sshll.u32 %s385_s1, 4  ;;  %s263_s4 = int_to_ptr.vmem [resolvable:$true] %s262_s4 }
  0x2a   :  { %v46_v10 = vshrl.u32 %v45_v7, 23  ;;  %v49_v11 = vand.u32 8388607, %v42_v6  ;;  %vm43_vm15 = vcmp.le.f32.partialorder %v42_v6, 0.7853982  ;;  %s349_s5 = scalar_lea.vmem %s263_s4, 256  ;;  %p354_p3 = scmp.lt.s32.totalorder %s263_s4, %s263_s4 }
  0x2b   :  { %v150_v12 = vshrl.u32 %v149_v9, 23  ;;  %v153_v13 = vand.u32 8388607, %v146_v8  ;;  %p350_p2 = scmp.ne.s32.totalorder %s263_s4, %s349_s5  ;;  %p355_p4 = scmp.lt.s32.totalorder %s349_s5, %s349_s5 }
  0x2c   :  { %v272_v14 = vadd.s32 4294967169, %v46_v10  ;;  %v50_v17 = vor.u32 8388608, %v49_v11 }
  0x2d   :  { %v276_v15 = vadd.s32 4294967169, %v150_v12  ;;  %v154_v18 = vor.u32 8388608, %v153_v13  ;;  %p356_p5 = por %p355_p4, %p354_p3 }
  0x2e   :  { %v52_v16 = vadd.s32 1, %v272_v14  ;;  %v443_v24 = vshll.u32 %v50_v17, 8 }
  0x2f   :  { %v156_v19 = vadd.s32 1, %v276_v15  ;;  %v445_v26 = vshll.u32 %v154_v18, 8  ;;  %p357_p6 = pnand %p356_p5, %p350_p2 }
  0x30   :  { %vm53_vm0 = vcmp.gt.s32.totalorder %v52_v16, 0 }
  0x31   :  { %v54_v20 = vsel %vm53_vm0, %v52_v16, 0  ;;  %vm157_vm1 = vcmp.gt.s32.totalorder %v156_v19, 0  ;;  %vm148_vm0 = vcmp.lt.s32.totalorder %v433_v5, 0 }
  0x32   :  { %v55_v21 = vshrl.u32 %v54_v20, 5  ;;  %v56_v22 = vand.u32 31, %v54_v20  ;;  %v158_v23 = vsel %vm157_vm1, %v156_v19, 0  ;;  %vm147_vm1 = vcmp.le.f32.partialorder %v146_v8, 0.7853982 }
  0x33   :  { %v160_v25 = vand.u32 31, %v158_v23  ;;  %v447_v38 = vshrl.u32 %v158_v23, 5 }
  0x34   :  { %v57_v27 = vsub.s32 32, %v56_v22  ;;  %v59_v29 = vshll.u32 %v379_v28, %v56_v22  ;;  %v62_v31 = vshll.u32 %v380_v30, %v56_v22  ;;  %v65_v33 = vshll.u32 %v381_v32, %v56_v22 }
  0x35   :  { %v68_v35 = vshll.u32 %v382_v34, %v56_v22  ;;  %v71_v37 = vshll.u32 %v383_v36, %v56_v22  ;;  %vm74_vm2 = vcmp.lt.s32.totalorder %v55_v21, 1  ;;  %vm75_vm3 = vcmp.lt.s32.totalorder %v55_v21, 2 }
  0x36   :  { %v58_v39 = vshrl.u32 %v379_v28, %v57_v27  ;;  %v60_v40 = vshrl.u32 %v380_v30, %v57_v27  ;;  %v63_v41 = vshrl.u32 %v381_v32, %v57_v27  ;;  %v66_v42 = vshrl.u32 %v382_v34, %v57_v27 }
  0x37   :  { %v69_v43 = vshrl.u32 %v383_v36, %v57_v27  ;;  %v72_v45 = vshrl.u32 %v384_v44, %v57_v27  ;;  %vm77_vm4 = vcmp.lt.s32.totalorder %v55_v21, 4  ;;  %v161_v49 = vsub.s32 32, %v160_v25 }
  0x38   :  { %v61_v46 = vor.u32 %v60_v40, %v59_v29  ;;  %v64_v47 = vor.u32 %v63_v41, %v62_v31  ;;  %v67_v48 = vor.u32 %v66_v42, %v65_v33  ;;  %vm76_vm5 = vcmp.lt.s32.totalorder %v55_v21, 3 }
  0x39   :  { %v70_v50 = vor.u32 %v69_v43, %v68_v35  ;;  %v73_v51 = vor.u32 %v72_v45, %v71_v37  ;;  %v163_v52 = vshll.u32 %v379_v28, %v160_v25  ;;  %v166_v60 = vshll.u32 %v380_v30, %v160_v25 }
  0x3a   :  { %v78_v53 = vsel %vm74_vm2, %v58_v39, %v61_v46  ;;  %v79_v54 = vsel %vm77_vm4, %v67_v48, 2102212464  ;;  %v82_v55 = vsel %vm74_vm2, %v61_v46, %v64_v47  ;;  %v86_v56 = vsel %vm74_vm2, %v64_v47, %v67_v48 }
  0x3b   :  { %v80_v57 = vsel %vm76_vm5, %v64_v47, %v79_v54  ;;  %v83_v58 = vsel %vm77_vm4, %v70_v50, 920167782  ;;  %v87_v59 = vsel %vm77_vm4, %v73_v51, 1326507024  ;;  %v162_v63 = vshrl.u32 %v379_v28, %v161_v49 }
  0x3c   :  { %v84_v61 = vsel %vm76_vm5, %v67_v48, %v83_v58  ;;  %v88_v62 = vsel %vm76_vm5, %v70_v50, %v87_v59  ;;  %v164_v1 = vshrl.u32 %v380_v30, %v161_v49  ;;  %v81_v4 = vsel %vm75_vm3, %v78_v53, %v80_v57 }
  0x3d   :  { %v85_v7 = vsel %vm75_vm3, %v82_v55, %v84_v61  ;;  %v89_v9 = vsel %vm75_vm3, %v86_v56, %v88_v62  ;;  %v167_v10 = vshrl.u32 %v381_v32, %v161_v49  ;;  %v169_v17 = vshll.u32 %v381_v32, %v160_v25 }
  0x3e   :  { %v456_v11 = vmul.u32.u64.low %v443_v24, %v89_v9  ;;  %v457_v12 = vmul.u32.u64.high %v443_v24, %v89_v9, %v456_v11  ;;  %v460_v13 = vmul.u32.u64.low %v443_v24, %v85_v7  ;;  %v461_v14 = vmul.u32.u64.high %v443_v24, %v85_v7, %v460_v13 }
  0x3f   :  { %v165_v15 = vor.u32 %v164_v1, %v163_v52  ;;  %v168_v16 = vor.u32 %v167_v10, %v166_v60  ;;  %v170_v18 = vshrl.u32 %v382_v34, %v161_v49  ;;  %v172_v19 = vshll.u32 %v382_v34, %v160_v25 }
  0x40   :  { %v173_v20 = vshrl.u32 %v383_v36, %v161_v49  ;;  %v175_v22 = vshll.u32 %v383_v36, %v160_v25  ;;  %v176_v23 = vshrl.u32 %v384_v44, %v161_v49  ;;  %v97_v21 = vmul.u32 %v443_v24, %v81_v4 }
  0x41   :  { %v171_v27 = vor.u32 %v170_v18, %v169_v17  ;;  %vm178_vm6 = vcmp.lt.s32.totalorder %v447_v38, 1  ;;  %vm179_vm7 = vcmp.lt.s32.totalorder %v447_v38, 2  ;;  %vm99_vm8 = vc.u32 %v457_v12, %v460_v13 }
  0x42   :  { %v100_v28 = vadd.s32 1, %v461_v14  ;;  %v174_v29 = vor.u32 %v173_v20, %v172_v19  ;;  %vm180_vm9 = vcmp.lt.s32.totalorder %v447_v38, 3  ;;  %v177_v30 = vor.u32 %v176_v23, %v175_v22 }
  0x43   :  { %vm181_vm10 = vcmp.lt.s32.totalorder %v447_v38, 4  ;;  %v182_v31 = vsel %vm178_vm6, %v162_v63, %v165_v15  ;;  %v186_v25 = vsel %vm178_vm6, %v165_v15, %v168_v16  ;;  %v190_v34 = vsel %vm178_vm6, %v168_v16, %v171_v27 }
  0x44   :  { %v101_v32 = vsel %vm99_vm8, %v100_v28, %v461_v14  ;;  %v183_v24 = vsel %vm181_vm10, %v171_v27, 2102212464  ;;  %v187_v33 = vsel %vm181_vm10, %v174_v29, 920167782  ;;  %v191_v39 = vsel %vm181_vm10, %v177_v30, 1326507024 }
  0x45   :  { %v102_v35 = vadd.s32 %v101_v32, %v97_v21  ;;  %v184_v36 = vsel %vm180_vm9, %v168_v16, %v183_v24  ;;  %v188_v37 = vsel %vm180_vm9, %v171_v27, %v187_v33  ;;  %v192_v42 = vsel %vm180_vm9, %v174_v29, %v191_v39 }
  0x46   :  { %v185_v40 = vsel %vm179_vm7, %v182_v31, %v184_v36  ;;  %v189_v41 = vsel %vm179_vm7, %v186_v25, %v188_v37  ;;  %v193_v44 = vsel %vm179_vm7, %v190_v34, %v192_v42  ;;  %v98_v63 = vadd.s32 %v460_v13, %v457_v12 }
  0x47   :  { %v103_v43 = vadd.s32 536870912, %v102_v35  ;;  %v478_v45 = vmul.u32.u64.low %v445_v26, %v189_v41  ;;  %v479_v46 = vmul.u32.u64.high %v445_v26, %v189_v41, %v478_v45  ;;  %v201_v50 = vmul.u32 %v445_v26, %v185_v40 }
  0x48   :  { %v482_v47 = vmul.u32.u64.low %v445_v26, %v193_v44  ;;  %v483_v48 = vmul.u32.u64.high %v445_v26, %v193_v44, %v482_v47  ;;  %vm134_vm5 = vweird.f32 %v430_v3  ;;  %vm238_vm9 = vweird.f32 %v433_v5 }
  0x49   :  { %v104_v49 = vshrl.u32 %v103_v43, 30  ;;  %v204_v52 = vadd.s32 1, %v479_v46 }
  0x4a   :  { %vm203_vm11 = vc.u32 %v483_v48, %v478_v45  ;;  %v202_v22 = vadd.s32 %v478_v45, %v483_v48 }
  0x4b   :  { %v105_v51 = vshll.u32 %v104_v49, 30  ;;  %v205_v38 = vsel %vm203_vm11, %v204_v52, %v479_v46  ;;  %v128_v12 = vsub.s32 4, %v104_v49 }
  0x4c   :  { %v206_v54 = vadd.s32 %v205_v38, %v201_v50 }
  0x4d   :  { %v106_v53 = vsub.s32 %v102_v35, %v105_v51  ;;  %v129_v32 = vsel %vm44_vm14, %v128_v12, %v104_v49 }
  0x4e   :  { %v207_v56 = vadd.s32 536870912, %v206_v54  ;;  %v131_v36 = vsel %vm43_vm15, 0, %v129_v32 }
  0x4f   :  { %v108_v55 = vsub.s32 0, %v106_v53  ;;  %v135_v42 = vadd.s32 3, %v131_v36 }
  0x50   :  { %v208_v58 = vshrl.u32 %v207_v56, 30 }
  0x51   :  { %v273_v57 = vmin.u32 %v108_v55, %v106_v53  ;;  %v136_v45 = vand.u32 3, %v135_v42 }
  0x52   :  { %v209_v60 = vshll.u32 %v208_v58, 30  ;;  %v232_v41 = vsub.s32 4, %v208_v58 }
  0x53   :  { %v110_v59 = vclz %v273_v57  ;;  %vm141_vm2 = vcmp.eq.s32.totalorder %v136_v45, 2  ;;  %vm138_vm3 = vcmp.eq.s32.totalorder %v136_v45, 0  ;;  %vm137_vm4 = vcmp.lt.s32.totalorder %v136_v45, 2 }
  0x54   :  { %v210_v62 = vsub.s32 %v206_v54, %v209_v60  ;;  %v233_v44 = vsel %vm148_vm0, %v232_v41, %v208_v58 }
  0x55   :  { %v274_v61 = vadd.s32 4294967294, %v110_v59  ;;  %v235_v48 = vsel %vm147_vm1, 0, %v233_v44 }
  0x56   :  { %v212_v1 = vsub.s32 0, %v210_v62  ;;  %v239_v52 = vadd.s32 3, %v235_v48 }
  0x57   :  { %vm275_vm12 = vcmp.lt.s32.totalorder %v274_v61, 0 }
  0x58   :  { %v113_v26 = vsel %vm275_vm12, 0, %v274_v61  ;;  %v277_v10 = vmin.u32 %v212_v1, %v210_v62  ;;  %v240_v55 = vand.u32 3, %v239_v52 }
  0x59   :  { %v114_v4 = vsub.s32 32, %v113_v26  ;;  %v115_v7 = vshll.u32 %v106_v53, %v113_v26  ;;  %v118_v9 = vsub.s32 4294967266, %v113_v26 }
  0x5a   :  { %v214_v15 = vclz %v277_v10  ;;  %vm245_vm6 = vcmp.eq.s32.totalorder %v240_v55, 2  ;;  %vm242_vm7 = vcmp.eq.s32.totalorder %v240_v55, 0  ;;  %vm241_vm8 = vcmp.lt.s32.totalorder %v240_v55, 2 }
  0x5b   :  { %v116_v11 = vshrl.u32 %v98_v63, %v114_v4  ;;  %v119_v14 = vadd.s32 127, %v118_v9 }
  0x5c   :  { %v278_v18 = vadd.s32 4294967294, %v214_v15 }
  0x5d   :  { %v117_v16 = vor.u32 %v116_v11, %v115_v7  ;;  %v120_v17 = vshll.u32 %v119_v14, 23 }
  0x5e   :  { %vm279_vm13 = vcmp.lt.s32.totalorder %v278_v18, 0 }
  0x5f   :  { %v121_v19 = vor.u32 4788187, %v120_v17  ;;  %v124_v20 = vcvt.s32.f32 %v117_v16  ;;  %v217_v13 = vsel %vm279_vm13, 0, %v278_v18 }
  0x60   :  { %v218_v21 = vsub.s32 32, %v217_v13  ;;  %v219_v27 = vshll.u32 %v210_v62, %v217_v13  ;;  %v222_v28 = vsub.s32 4294967266, %v217_v13 }
  0x61   :  { %v122_v23 = vand.u32 2147483647, %v121_v19 }
  0x62   :  { %v220_v30 = vshrl.u32 %v202_v22, %v218_v21  ;;  %v223_v31 = vadd.s32 127, %v222_v28 }
  0x63   :  { %v125_v29 = vmul.f32 %v124_v20, %v122_v23 }
  0x64   :  { %v221_v24 = vor.u32 %v220_v30, %v219_v27  ;;  %v224_v33 = vshll.u32 %v223_v31, 23 }
  0x65   :  { %v126_v25 = vxor.u32 2147483648, %v125_v29 }
  0x66   :  { %v225_v37 = vor.u32 4788187, %v224_v33  ;;  %v228_v39 = vcvt.s32.f32 %v221_v24 }
  0x67   :  { %v127_v34 = vsel %vm44_vm14, %v126_v25, %v125_v29 }
  0x68   :  { %v130_v35 = vsel %vm43_vm15, %v430_v3, %v127_v34  ;;  %v226_v40 = vand.u32 2147483647, %v225_v37 }
  0x69   :  { %297 = vcosq.f32 %v130_v35 }
  0x6a   :  { %299 = vsinq.f32 %v130_v35  ;;  %v229_v43 = vmul.f32 %v228_v39, %v226_v40 }
  0x6c   :  { %v230_v6 = vxor.u32 2147483648, %v229_v43 }
  0x6e   :  { %v231_v46 = vsel %vm148_vm0, %v230_v6, %v229_v43 }
  0x6f   :  { %v234_v47 = vsel %vm147_vm1, %v433_v5, %v231_v46 }
  0x70   :  { %301 = vcosq.f32 %v234_v47 }
  0x71   :  { %303 = vsinq.f32 %v234_v47 }
  0x73   :  { %v298_v49 = vpop.eup %297 }
  0x74   :  { %v300_v50 = vpop.eup %299  ;;  %v142_v51 = vxor.u32 2147483648, %v298_v49 }
  0x75   :  { %v139_v53 = vxor.u32 2147483648, %v300_v50 }
  0x76   :  { %v143_v8 = vsel %vm141_vm2, %v142_v51, %v300_v50 }
  0x77   :  { %v140_v38 = vsel %vm138_vm3, %v298_v49, %v139_v53 }
  0x78   :  { %v144_v54 = vsel %vm137_vm4, %v140_v38, %v143_v8 }
  0x79   :  { %v145_v56 = vsel %vm134_vm5, nan, %v144_v54 }
  0x7a   :  { %v250_v57 = vmul.f32 %v145_v56, %v145_v56  ;;  %v302_v58 = vpop.eup %301 }
  0x7b   :  { %v304_v60 = vpop.eup %303  ;;  %v246_v61 = vxor.u32 2147483648, %v302_v58 }
  0x7c   :  { %v252_v59 = vsub.f32 %v250_v57, %v425_v0  ;;  %v243_v62 = vxor.u32 2147483648, %v304_v60 }
  0x7d   :  { %v247_v63 = vsel %vm245_vm6, %v246_v61, %v304_v60 }
  0x7e   :  { %254 = vst [vmem:[#allocation7] sm:$0xff] %v252_v59  ;;  %v244_v3 = vsel %vm242_vm7, %v302_v58, %v243_v62 }
  0x7f   :  { %v248_v26 = vsel %vm241_vm8, %v244_v3, %v247_v63 }
  0x80   :  { %v249_v1 = vsel %vm238_vm9, nan, %v248_v26 }
  0x81   :  { %v251_v4 = vmul.f32 %v249_v1, %v249_v1 }
  0x83   :  { %v253_v7 = vsub.f32 %v251_v4, %v427_v2 }
  0x85   :  { %255 = vst [vmem:[#allocation7 + $0x8] sm:$0xff] %v253_v7 }
  0x86   :  { %360 = shalt.err (!%p357_p6)
}
  0x87   :  { %s361_s8 = scalar_lea.hbm %s517_s2, 256 }
  0x88   :  { %p362_p7 = scmp.ne.s32.totalorder %s517_s2, %s361_s8  ;;  %p365_p8 = scmp.lt.u32.totalorder %s361_s8, %s517_s2 }
  0x8a   :  { %p367_p9 = pnand %p365_p8, %p362_p7 }
  0x8c   :  { %370 = shalt.err (!%p367_p9)
}
  0x8d   :  { %265 = dma.vmem_to_hbm [thread:$0]  %s263_s4, 256, %s517_s2, [#allocation4]  }
  0x8e   :  { %375 = dma.done.wait [#allocation4], 256  }
  0x8f   :  { %376 = vsyncadd [#allocation4], 4294967040 }
  0x90   :  { %269 = vsyncpa [#allocation3], 1 }
  0x91   :  { %270 = vsyncpa [#allocation6], 1 }
  0x92   :  { %271 = vsyncpa [#allocation4], 1 }

</bundles_post_ra>
